<compile_context>
chip_gen: v5e
topology: v5e:2x2
jax: 0.10.0
libtpu: 0.0.40
codegen_flags: <defaults>
</compile_context>

<pallas_src>
import jax
import jax.numpy as jnp
from jax.experimental import pallas as pl
from jax.experimental.pallas import tpu as pltpu


# -----------------------------------------------------------------------------
# helpers
# -----------------------------------------------------------------------------
def _round_up(x, m):
    return ((x + m - 1) // m) * m


def _largest_divisor_leq(n, cap):
    cap = max(1, min(n, cap))
    for d in range(cap, 0, -1):
        if n % d == 0:
            return d
    return 1


def _choose_time_chunk(T, target):
    """Pick timestep-chunk size. Prefer an exact divisor of T; otherwise pad T up
    to a multiple of `target` (padded steps are masked inside the kernels)."""
    d = _largest_divisor_leq(T, target)
    if d >= min(T, target) // 2 or d >= 8:
        return d, T
    tc = min(T, target)
    return tc, _round_up(T, tc)


def _vmem_limit(bytes_needed):
    # Explicit scoped-VMEM limit: 2x headroom over the block budget, floor at the
    # v5e default (16 MiB), cap below v7x's 64 MiB physical VMEM.
    return int(min(max(2 * bytes_needed, 16 * 1024 * 1024), 48 * 1024 * 1024))


def _sigmoid(x):
    # One EUP op (tanh) + cheap VPU mul/add instead of exp + reciprocal.
    return 0.5 * jnp.tanh(0.5 * x) + 0.5


# -----------------------------------------------------------------------------
# Kernel 1: hoisted input projection for layer 0:
#           Z = X @ W_ih^T + (b_ih + b_hh), one big (M, K) x (K, 4H) matmul.
# -----------------------------------------------------------------------------
def _inproj_kernel(x_ref, w_ref, b_ref, z_ref):
    acc = jnp.dot(x_ref[...], w_ref[...], preferred_element_type=jnp.float32)
    z_ref[...] = (acc + b_ref[...]).astype(z_ref.dtype)


def input_projection(x2d, w_t, bias):
    """x2d: (M, K) bf16, w_t: (K, N) bf16, bias: (1, N) f32 -> (M, N) bf16."""
    M, K = x2d.shape
    N = w_t.shape[1]
    tm = _largest_divisor_leq(M, 512)
    needed = 2 * tm * K * 2 + K * N * 2 + N * 4 + 2 * tm * N * 2
    cost = pl.CostEstimate(flops=2 * M * K * N, transcendentals=0,
                           bytes_accessed=2 * (M * K + K * N + M * N))
    return pl.pallas_call(
        _inproj_kernel,
        out_shape=jax.ShapeDtypeStruct((M, N), jnp.bfloat16),
        grid_spec=pltpu.PrefetchScalarGridSpec(
            num_scalar_prefetch=0,
            grid=(M // tm,),
            in_specs=[
                pl.BlockSpec((tm, K), lambda m: (m, 0)),
                pl.BlockSpec((K, N), lambda m: (0, 0),
                             pipeline_mode=pl.Buffered(1)),
                pl.BlockSpec((1, N), lambda m: (0, 0),
                             pipeline_mode=pl.Buffered(1)),
            ],
            out_specs=pl.BlockSpec((tm, N), lambda m: (m, 0)),
        ),
        compiler_params=pltpu.CompilerParams(
            dimension_semantics=("parallel",),
            vmem_limit_bytes=_vmem_limit(needed)),
        cost_estimate=cost,
    )(x2d, w_t, bias)


# -----------------------------------------------------------------------------
# Kernel 2: recurrence for an intermediate layer, chunked over time, fused with
#           the NEXT layer's input projection (emits z_{l+1} chunks, no hseq HBM
#           round-trip).  h/c carried in vregs inside the chunk.
# -----------------------------------------------------------------------------
def _make_mid_kernel(tc, Bb, H_pad, t_valid, needs_mask, unroll):
    def kernel(z_ref, whh_ref, wih_next_ref, bnext_ref, znext_ref,
               h_sc, c_sc, hbuf_sc):
        chunk = pl.program_id(1)

        @pl.when(chunk == 0)
        def _():
            h_sc[...] = jnp.zeros_like(h_sc)
            c_sc[...] = jnp.zeros_like(c_sc)

        def step(s, carry):
            h, c = carry
            z = z_ref[s].astype(jnp.float32) + jnp.dot(
                h.astype(jnp.bfloat16), whh_ref[...],
                preferred_element_type=jnp.float32)
            i = _sigmoid(z[:, 0 * H_pad:1 * H_pad])
            f = _sigmoid(z[:, 1 * H_pad:2 * H_pad])
            g = jnp.tanh(z[:, 2 * H_pad:3 * H_pad])
            o = _sigmoid(z[:, 3 * H_pad:4 * H_pad])
            c_new = f * c + i * g
            h_new = o * jnp.tanh(c_new)
            if needs_mask:
                valid = (chunk * tc + s) < t_valid
                c_new = jnp.where(valid, c_new, c)
                h_new = jnp.where(valid, h_new, h)
            row = pl.multiple_of(s * Bb, Bb)
            hbuf_sc[pl.ds(row, Bb), :] = h_new
            return (h_new, c_new)

        hN, cN = jax.lax.fori_loop(0, tc, step, (h_sc[...], c_sc[...]),
                                   unroll=unroll)
        h_sc[...] = hN
        c_sc[...] = cN

        # Chunk epilogue: z_{l+1} = H_chunk @ W_ih^{l+1} + (b_ih + b_hh)^{l+1}
        # with M = tc*Bb (decent MXU fill), emitted directly in bf16.
        h2d = hbuf_sc[...].astype(jnp.bfloat16)
        znext = jnp.dot(h2d, wih_next_ref[...],
                        preferred_element_type=jnp.float32) + bnext_ref[...]
        znext_ref[...] = znext.reshape(tc, Bb, 4 * H_pad).astype(znext_ref.dtype)

    return kernel


def lstm_mid_layer(z, w_hh_t, w_ih_next_t, bias_next, tc, t_valid, nb):
    """z: (T_pad, B_pad, 4H_pad) bf16 -> z_next: (T_pad, B_pad, 4H_pad) bf16."""
    T_pad, B_pad, N = z.shape
    H_pad = w_hh_t.shape[0]
    Bb = B_pad // nb
    nchunks = T_pad // tc
    needs_mask = (t_valid != T_pad)
    unroll = True if Bb <= 16 else 8   # keep full unroll only while spill-free
    kernel = _make_mid_kernel(tc, Bb, H_pad, t_valid, needs_mask, unroll)

    zblk = tc * Bb * N * 2
    needed = (2 * zblk + 2 * zblk            # z in + z_next out (double-buffered)
              + 2 * H_pad * N * 2            # W_hh + W_ih_next (bf16, single buf)
              + N * 4                        # bias_next
              + 2 * Bb * H_pad * 4           # h, c scratch
              + tc * Bb * H_pad * 4)         # hbuf scratch
    cost = pl.CostEstimate(
        flops=4 * T_pad * B_pad * H_pad * N + 12 * T_pad * B_pad * H_pad,
        transcendentals=4 * T_pad * B_pad * H_pad,
        bytes_accessed=2 * (2 * z.size + 2 * H_pad * N))
    const = lambda b, c: (0, 0)
    return pl.pallas_call(
        kernel,
        out_shape=jax.ShapeDtypeStruct((T_pad, B_pad, N), jnp.bfloat16),
        grid_spec=pltpu.PrefetchScalarGridSpec(
            num_scalar_prefetch=0,
            grid=(nb, nchunks),
            in_specs=[
                pl.BlockSpec((tc, Bb, N), lambda b, c: (c, b, 0)),
                pl.BlockSpec((H_pad, N), const, pipeline_mode=pl.Buffered(1)),
                pl.BlockSpec((H_pad, N), const, pipeline_mode=pl.Buffered(1)),
                pl.BlockSpec((1, N), const, pipeline_mode=pl.Buffered(1)),
            ],
            out_specs=pl.BlockSpec((tc, Bb, N), lambda b, c: (c, b, 0)),
            scratch_shapes=[pltpu.VMEM((Bb, H_pad), jnp.float32),
                            pltpu.VMEM((Bb, H_pad), jnp.float32),
                            pltpu.VMEM((tc * Bb, H_pad), jnp.float32)],
        ),
        compiler_params=pltpu.CompilerParams(
            dimension_semantics=("parallel", "arbitrary"),
            vmem_limit_bytes=_vmem_limit(needed)),
        cost_estimate=cost,
    )(z, w_hh_t, w_ih_next_t, bias_next)


# -----------------------------------------------------------------------------
# Kernel 3: last-layer recurrence + fused fc head
#           (LeakyReLU(0.1) -> BatchNorm1d(eval) -> Linear(H, 1)).
# -----------------------------------------------------------------------------
def _make_last_kernel(tc, Bb, H_pad, t_valid, needs_mask, unroll):
    def kernel(z_ref, whh_ref, gamma_ref, beta_ref, mean_ref, var_ref,
               fcw_ref, fcb_ref, y_ref, h_sc, c_sc):
        chunk = pl.program_id(1)

        @pl.when(chunk == 0)
        def _():
            h_sc[...] = jnp.zeros_like(h_sc)
            c_sc[...] = jnp.zeros_like(c_sc)

        def step(s, carry):
            h, c = carry
            z = z_ref[s].astype(jnp.float32) + jnp.dot(
                h.astype(jnp.bfloat16), whh_ref[...],
                preferred_element_type=jnp.float32)
            i = _sigmoid(z[:, 0 * H_pad:1 * H_pad])
            f = _sigmoid(z[:, 1 * H_pad:2 * H_pad])
            g = jnp.tanh(z[:, 2 * H_pad:3 * H_pad])
            o = _sigmoid(z[:, 3 * H_pad:4 * H_pad])
            c_new = f * c + i * g
            h_new = o * jnp.tanh(c_new)
            if needs_mask:
                valid = (chunk * tc + s) < t_valid
                c_new = jnp.where(valid, c_new, c)
                h_new = jnp.where(valid, h_new, h)
            return (h_new, c_new)

        hN, cN = jax.lax.fori_loop(0, tc, step, (h_sc[...], c_sc[...]),
                                   unroll=unroll)
        h_sc[...] = hN
        c_sc[...] = cN

        @pl.when(chunk == pl.num_programs(1) - 1)
        def _():
            h = jnp.where(hN >= 0, hN, 0.1 * hN)                 # LeakyReLU(0.1)
            inv = jax.lax.rsqrt(var_ref[...] + 1e-5)             # BN (eval stats)
            hn = (h - mean_ref[...]) * inv * gamma_ref[...] + beta_ref[...]
            # 1-column Linear: elementwise mul + lane reduction (no wasted MXU
            # output lanes, no extra kernel launch / HBM round-trip of h_last).
            y_ref[...] = (jnp.sum(hn * fcw_ref[...], axis=-1, keepdims=True)
                          + fcb_ref[...])

    return kernel


def lstm_last_layer(z, w_hh_t, bn, fc, tc, t_valid, nb):
    """z: (T_pad, B_pad, 4H_pad) bf16 -> y: (B_pad, 1) f32."""
    T_pad, B_pad, N = z.shape
    H_pad = w_hh_t.shape[0]
    Bb = B_pad // nb
    nchunks = T_pad // tc
    needs_mask = (t_valid != T_pad)
    unroll = True if Bb <= 16 else 8
    kernel = _make_last_kernel(tc, Bb, H_pad, t_valid, needs_mask, unroll)

    zblk = tc * Bb * N * 2
    needed = (2 * zblk + H_pad * N * 2 + 7 * H_pad * 4
              + 2 * Bb * 4 + 2 * Bb * H_pad * 4)
    cost = pl.CostEstimate(
        flops=2 * T_pad * B_pad * H_pad * N + 12 * T_pad * B_pad * H_pad,
        transcendentals=4 * T_pad * B_pad * H_pad,
        bytes_accessed=2 * z.size + 2 * H_pad * N + 4 * B_pad)
    const = lambda b, c: (0, 0)
    return pl.pallas_call(
        kernel,
        out_shape=jax.ShapeDtypeStruct((B_pad, 1), jnp.float32),
        grid_spec=pltpu.PrefetchScalarGridSpec(
            num_scalar_prefetch=0,
            grid=(nb, nchunks),
            in_specs=[
                pl.BlockSpec((tc, Bb, N), lambda b, c: (c, b, 0)),
                pl.BlockSpec((H_pad, N), const, pipeline_mode=pl.Buffered(1)),
                pl.BlockSpec((1, H_pad), const, pipeline_mode=pl.Buffered(1)),  # gamma
                pl.BlockSpec((1, H_pad), const, pipeline_mode=pl.Buffered(1)),  # beta
                pl.BlockSpec((1, H_pad), const, pipeline_mode=pl.Buffered(1)),  # mean
                pl.BlockSpec((1, H_pad), const, pipeline_mode=pl.Buffered(1)),  # var
                pl.BlockSpec((1, H_pad), const, pipeline_mode=pl.Buffered(1)),  # fc w
                pl.BlockSpec((1, 1), const, pipeline_mode=pl.Buffered(1)),      # fc b
            ],
            out_specs=pl.BlockSpec((Bb, 1), lambda b, c: (b, 0)),
            scratch_shapes=[pltpu.VMEM((Bb, H_pad), jnp.float32),
                            pltpu.VMEM((Bb, H_pad), jnp.float32)],
        ),
        compiler_params=pltpu.CompilerParams(
            dimension_semantics=("parallel", "arbitrary"),
            vmem_limit_bytes=_vmem_limit(needed)),
        cost_estimate=cost,
    )(z, w_hh_t, bn["gamma"], bn["beta"], bn["mean"], bn["var"],
      fc["w"], fc["b"])


# -----------------------------------------------------------------------------
# Full module forward
# -----------------------------------------------------------------------------
def lstm_model_forward(x_bti, kp):
    """x_bti: (B, T, I) float32. Returns (B, 1) float32."""
    B, T, I = x_bti.shape
    H_pad, I_pad = kp["H_pad"], kp["I_pad"]
    B_pad = _round_up(B, 8)

    # Batch-parallel grid axis (2nd TensorCore on v7x); only when cleanly splittable.
    nb = 2 if (B_pad % 32 == 0) else 1
    Bb = B_pad // nb

    # Timestep chunk derived from a VMEM block budget (z-in + z-out, double-buffered).
    blk_budget = 8 * 1024 * 1024
    per_step_bytes = Bb * 4 * H_pad * 2 * 4
    t_target = max(8, min(64, blk_budget // max(1, per_step_bytes)))
    tc, T_pad = _choose_time_chunk(T, t_target)

    # Time-major layout, batch padded to a sublane multiple, features lane-padded.
    x = jnp.zeros((T_pad, B_pad, I_pad), jnp.float32)
    x = x.at[:T, :B, :I].set(jnp.transpose(x_bti, (1, 0, 2)))
    x2d = x.reshape(T_pad * B_pad, I_pad).astype(jnp.bfloat16)

    layers = kp["lstm"]
    L = len(layers)

    # Layer 0: hoisted input projection, one big (T*B, I) x (I, 4H) MXU matmul.
    z = input_projection(x2d, layers[0]["w_ih_t"], layers[0]["bias"])
    z = z.reshape(T_pad, B_pad, 4 * H_pad)

    # Intermediate layers: recurrence fused with the next layer's input projection.
    # TODO(synk): training-mode inter-layer dropout not implemented (eval mode).
    for li in range(L - 1):
        z = lstm_mid_layer(z, layers[li]["w_hh_t"],
                           layers[li + 1]["w_ih_t"], layers[li + 1]["bias"],
                           tc, T, nb)

    # Last layer recurrence + fused fc head.
    y_pad = lstm_last_layer(z, layers[L - 1]["w_hh_t"], kp["bn"], kp["fc"],
                            tc, T, nb)
    return y_pad[:B]


# -----------------------------------------------------------------------------
# Parameter init (PyTorch-shaped) + kernel-layout preparation (padded, gate-aligned)
# -----------------------------------------------------------------------------
def init_params(key, input_size, hidden_size, num_layers):
    H = hidden_size
    stdv = 1.0 / (H ** 0.5)
    layers = []
    for layer in range(num_layers):
        in_sz = input_size if layer == 0 else H
        key, k1, k2, k3, k4 = jax.random.split(key, 5)
        layers.append(dict(
            w_ih=jax.random.uniform(k1, (4 * H, in_sz), jnp.float32, -stdv, stdv),
            w_hh=jax.random.uniform(k2, (4 * H, H), jnp.float32, -stdv, stdv),
            b_ih=jax.random.uniform(k3, (4 * H,), jnp.float32, -stdv, stdv),
            b_hh=jax.random.uniform(k4, (4 * H,), jnp.float32, -stdv, stdv),
        ))
    key, k5, k6, k7, k8 = jax.random.split(key, 5)
    fc_w = jax.random.uniform(k5, (1, H), jnp.float32, -stdv, stdv)
    fc_b = jax.random.uniform(k6, (1,), jnp.float32, -stdv, stdv)
    gamma = 1.0 + 0.1 * jax.random.normal(k7, (H,), jnp.float32)
    beta = 0.1 * jax.random.normal(k8, (H,), jnp.float32)
    return dict(
        lstm=layers,
        fc=dict(w=fc_w, b=fc_b),
        bn=dict(gamma=gamma, beta=beta,
                mean=jnp.zeros((H,), jnp.float32),
                var=jnp.ones((H,), jnp.float32)),
    )


def _pad_gate_cols(w, H, H_pad):
    """(rows, 4H) -> (rows, 4*H_pad) with gate k placed at 128-aligned column block k."""
    rows = w.shape[0]
    out = jnp.zeros((rows, 4 * H_pad), jnp.float32)
    for k in range(4):
        out = out.at[:, k * H_pad:k * H_pad + H].set(w[:, k * H:(k + 1) * H])
    return out


def prepare_kernel_params(params, input_size, hidden_size):
    """Pad to lane/sublane-friendly shapes; zero padding keeps padded h/c columns at 0.
    Matmul weights stored in bf16 (f32 accumulation in-kernel)."""
    H = hidden_size
    H_pad = _round_up(H, 128)
    I_pad = _round_up(input_size, 128)
    layers = []
    for li, layer in enumerate(params["lstm"]):
        in_sz = input_size if li == 0 else H
        in_pad = I_pad if li == 0 else H_pad
        w_ih_cols = _pad_gate_cols(layer["w_ih"].T, H, H_pad)       # (in, 4H_pad)
        w_hh_cols = _pad_gate_cols(layer["w_hh"].T, H, H_pad)       # (H, 4H_pad)
        bias_cols = _pad_gate_cols((layer["b_ih"] + layer["b_hh"])[None, :], H, H_pad)
        w_ih_t = jnp.zeros((in_pad, 4 * H_pad), jnp.float32).at[:in_sz, :].set(w_ih_cols)
        w_hh_t = jnp.zeros((H_pad, 4 * H_pad), jnp.float32).at[:H, :].set(w_hh_cols)
        layers.append(dict(w_ih_t=w_ih_t.astype(jnp.bfloat16),
                           w_hh_t=w_hh_t.astype(jnp.bfloat16),
                           bias=bias_cols))
    bn = params["bn"]
    bn_p = dict(
        gamma=jnp.zeros((1, H_pad), jnp.float32).at[0, :H].set(bn["gamma"]),
        beta=jnp.zeros((1, H_pad), jnp.float32).at[0, :H].set(bn["beta"]),
        mean=jnp.zeros((1, H_pad), jnp.float32).at[0, :H].set(bn["mean"]),
        var=jnp.ones((1, H_pad), jnp.float32).at[0, :H].set(bn["var"]),
    )
    fc_p = dict(
        w=jnp.zeros((1, H_pad), jnp.float32).at[0, :H].set(params["fc"]["w"][0]),
        b=params["fc"]["b"].reshape(1, 1).astype(jnp.float32),
    )
    return dict(lstm=layers, bn=bn_p, fc=fc_p, H_pad=H_pad, I_pad=I_pad)


# -----------------------------------------------------------------------------
# Pure-JAX f32 reference (correctness check)
# -----------------------------------------------------------------------------
def reference_forward(x_bti, params, hidden_size):
    H = hidden_size
    h_seq = jnp.transpose(x_bti, (1, 0, 2))
    for layer in params["lstm"]:
        B = h_seq.shape[1]
        w_ih_t, w_hh_t = layer["w_ih"].T, layer["w_hh"].T
        bias = layer["b_ih"] + layer["b_hh"]

        def step(carry, x_t, w_ih_t=w_ih_t, w_hh_t=w_hh_t, bias=bias):
            h, c = carry
            z = x_t @ w_ih_t + h @ w_hh_t + bias
            i = jax.nn.sigmoid(z[:, 0 * H:1 * H])
            f = jax.nn.sigmoid(z[:, 1 * H:2 * H])
            g = jnp.tanh(z[:, 2 * H:3 * H])
            o = jax.nn.sigmoid(z[:, 3 * H:4 * H])
            c = f * c + i * g
            h = o * jnp.tanh(c)
            return (h, c), h

        init = (jnp.zeros((B, H), jnp.float32), jnp.zeros((B, H), jnp.float32))
        _, h_seq = jax.lax.scan(step, init, h_seq)
    h = h_seq[-1]
    h = jnp.where(h >= 0, h, 0.1 * h)
    bn = params["bn"]
    h = (h - bn["mean"]) * jax.lax.rsqrt(bn["var"] + 1e-5) * bn["gamma"] + bn["beta"]
    return h @ params["fc"]["w"].T + params["fc"]["b"]


if __name__ == "__main__":
    B, T, I, H, L = 2, 8, 4, 32, 2

    key = jax.random.PRNGKey(0)
    key, kx, kp = jax.random.split(key, 3)
    x = jax.random.normal(kx, (B, T, I), jnp.float32)
    params = init_params(kp, input_size=I, hidden_size=H, num_layers=L)
    kparams = prepare_kernel_params(params, input_size=I, hidden_size=H)

    y = jax.block_until_ready(lstm_model_forward(x, kparams))
    y_ref = jax.block_until_ready(reference_forward(x, params, hidden_size=H))

    assert y.shape == (B, 1), y.shape
    # bf16 weights / bf16 Z stream in the kernel path vs pure-f32 reference.
    assert jnp.allclose(y, y_ref, atol=5e-2, rtol=5e-2), (y, y_ref)
    print("KERNEL_OK")
</pallas_src>

<mosaic_0001>
module attributes {stable_mosaic.version = 11 : i64} {
  func.func @_inproj_kernel(%arg0: i32, %arg1: memref<64x128xbf16, #tpu.memory_space<vmem>>, %arg2: memref<128x512xbf16, #tpu.memory_space<vmem>>, %arg3: memref<1x512xf32, #tpu.memory_space<vmem>>, %arg4: memref<64x512xbf16, #tpu.memory_space<vmem>>) attributes {dimension_semantics = [#tpu.dimension_semantics<parallel>], iteration_bounds = array<i64: 1>, scalar_prefetch = 0 : i64, scratch_operands = 0 : i64, tpu.core_type = #tpu.core_type<tc>, window_params = [{transform_indices = @transform_0, window_bounds = array<i64: 64, 128>}, {pipeline_mode = #tpu.pipeline_mode<synchronous>, transform_indices = @transform_1, window_bounds = array<i64: 128, 512>}, {pipeline_mode = #tpu.pipeline_mode<synchronous>, transform_indices = @transform_2, window_bounds = array<i64: 1, 512>}, {transform_indices = @transform_3, window_bounds = array<i64: 64, 512>}]} {
    %c0 = arith.constant 0 : index
    %c0_0 = arith.constant 0 : index
    %0 = vector.load %arg1[%c0, %c0_0] : memref<64x128xbf16, #tpu.memory_space<vmem>>, vector<64x128xbf16>
    %c0_1 = arith.constant 0 : index
    %c0_2 = arith.constant 0 : index
    %1 = vector.load %arg2[%c0_1, %c0_2] : memref<128x512xbf16, #tpu.memory_space<vmem>>, vector<128x512xbf16>
    %cst = arith.constant dense<0.000000e+00> : vector<64x512xf32>
    %2 = tpu.matmul %0, %1, %cst {dimension_numbers = #tpu.dot_dimension_numbers<[1], [0], [0], [1], [0, 0, 1, 1], [], []>} : vector<64x128xbf16>, vector<128x512xbf16>, vector<64x512xf32> -> vector<64x512xf32>
    %c0_3 = arith.constant 0 : index
    %c0_4 = arith.constant 0 : index
    %3 = vector.load %arg3[%c0_3, %c0_4] : memref<1x512xf32, #tpu.memory_space<vmem>>, vector<1x512xf32>
    %4 = vector.broadcast %3 : vector<1x512xf32> to vector<64x512xf32>
    %5 = arith.addf %2, %4 : vector<64x512xf32>
    %6 = arith.truncf %5 : vector<64x512xf32> to vector<64x512xbf16>
    %c0_5 = arith.constant 0 : index
    %c0_6 = arith.constant 0 : index
    %7 = vector.load %arg4[%c0_5, %c0_6] : memref<64x512xbf16, #tpu.memory_space<vmem>>, vector<64x512xbf16>
    tpu.vector_store %arg4[%c0_5, %c0_6], %6 {strides = array<i32>} : memref<64x512xbf16, #tpu.memory_space<vmem>>, vector<64x512xbf16>,
    return
  }
  func.func @transform_0(%arg0: i32) -> (i32, i32) {
    %c0_i32 = arith.constant 0 : i32
    %c0_i32_0 = arith.constant 0 : i32
    return %arg0, %c0_i32 : i32, i32
  }
  func.func @transform_1(%arg0: i32) -> (i32, i32) {
    %c0_i32 = arith.constant 0 : i32
    %c0_i32_0 = arith.constant 0 : i32
    %c0_i32_1 = arith.constant 0 : i32
    return %c0_i32, %c0_i32_0 : i32, i32
  }
  func.func @transform_2(%arg0: i32) -> (i32, i32) {
    %c0_i32 = arith.constant 0 : i32
    %c0_i32_0 = arith.constant 0 : i32
    %c0_i32_1 = arith.constant 0 : i32
    return %c0_i32, %c0_i32_0 : i32, i32
  }
  func.func @transform_3(%arg0: i32) -> (i32, i32) {
    %c0_i32 = arith.constant 0 : i32
    %c0_i32_0 = arith.constant 0 : i32
    return %arg0, %c0_i32 : i32, i32
  }
}

</mosaic_0001>

<bundles_post_ra>
// kernel: tpu_custom_call.1
= control target key start
LH: loop header
LB: loop body
LE: loop exit
PB: predicated region body
PF: predicated region fallthrough
CT: control target
= control target key end

     0   :  { %8 = vsyncpa [#allocation3], 0  ;;  %s838_s0 = inlined_call_operand.hbm [shape: bf16[64,128], index: 0, kind: input, shape index: {}]   ;;  %s839_s1 = inlined_call_operand.hbm [shape: bf16[128,512], index: 1, kind: input, shape index: {}]   ;;  %s840_s2 = inlined_call_operand.hbm [shape: f32[1,512], index: 2, kind: input, shape index: {}]   ;;  %s841_s3 = inlined_call_operand.hbm [shape: bf16[64,512], index: 3, kind: output, shape index: {}]  }
   0x1   :  { %9 = vsyncpa [#allocation6], 0  ;;  %s28_s14 = sshll.u32 %s839_s1, 4  ;;  %s29_s14 = int_to_ptr.hbm [resolvable:$true] %s28_s14 }
   0x2   :  { %10 = vsyncpa [#allocation4], 0  ;;  %s752_s15 = smov [#allocation5]   ;;  %s15_s19 = sshll.u32 %s838_s0, 4  ;;  %s16_s19 = int_to_ptr.hbm [resolvable:$true] %s15_s19 }
   0x3   :  { %s30_s16 = sshll.u32 %s752_s15, 4  ;;  %s753_s20 = smov 256   ;;  %s31_s16 = int_to_ptr.vmem [resolvable:$true] %s30_s16 }
   0x4   :  { %s754_s21 = smov 16   ;;  %s755_s22 = smov [#allocation2]  }
   0x5   :  { %36 = dma.hbm_to_vmem [thread:$0]  %s29_s14, 4096, %s31_s16, [#allocation6], %s753_s20, %s753_s20, %s754_s21  }
   0x6   :  { %s17_s23 = sshll.u32 %s755_s22, 4  ;;  %s756_s1 = smov 64   ;;  %s18_s23 = int_to_ptr.vmem [resolvable:$true] %s17_s23 }
   0x7   :  { %s757_s24 = smov 4   ;;  %s42_s27 = sshll.u32 %s840_s2, 4  ;;  %s43_s27 = int_to_ptr.hbm [resolvable:$true] %s42_s27 }
   0x8   :  { %23 = dma.hbm_to_vmem [thread:$0]  %s16_s19, 512, %s18_s23, [#allocation3], %s756_s1, %s756_s1, %s757_s24  }
   0x9   :  { %s758_s28 = smov [#allocation7]  }
   0xa   :  { %s44_s0 = sshll.u32 %s758_s28, 4  ;;  %s45_s0 = int_to_ptr.vmem [resolvable:$true] %s44_s0 }
   0xb   :  { %47 = dma.hbm_to_vmem [thread:$0]  %s43_s27, 64, %s45_s0, [#allocation6]  }
   0xc   :  { %746 = dma.done.wait [#allocation3], 512  }
   0xd   :  { %747 = vsyncadd [#allocation3], 4294966784 }
   0xe   :  { %748 = dma.done.wait [#allocation6], 4160  }
   0xf   :  { %749 = vsyncadd [#allocation6], 4294963136  ;;  %v592_v0 = vld [vmem:[#allocation5 + $0xe0] sm:$0xf]  ;;  %v640_v1 = vld [vmem:[#allocation5 + $0xec] sm:$0xf0] }
  0x10   :  { %v638_v2 = vld [vmem:[#allocation5 + $0xe4] sm:$0xf]  ;;  %v593_v3 = vor.u32 %v640_v1, %v592_v0  ;;  %v594_v4 = vld [vmem:[#allocation5 + $0xf0] sm:$0xf0]  ;;  %v600_v5 = vld [vmem:[#allocation5 + $0xe8] sm:$0xf] }
  0x11   :  { %v641_v6 = vld [vmem:[#allocation5 + $0xf4] sm:$0xf0]  ;;  %v597_v7 = vor.u32 %v638_v2, %v594_v4  ;;  %v639_v9 = vld [vmem:[#allocation5 + $0xec] sm:$0xf]  ;;  %v602_v10 = vld [vmem:[#allocation5 + $0xf8] sm:$0xf0] }
  0x12   :  { %v601_v8 = vor.u32 %v641_v6, %v600_v5  ;;  %v576_v11 = vld [vmem:[#allocation5 + $0xc0] sm:$0xf]  ;;  %294 = vmatpush.bf16.msra.mxu0 %v593_v3  ;;  %v605_v12 = vor.u32 %v639_v9, %v602_v10  ;;  %v636_v13 = vld [vmem:[#allocation5 + $0xcc] sm:$0xf0]  ;;  %v634_v14 = vld [vmem:[#allocation5 + $0xc4] sm:$0xf] }
  0x13   :  { %v578_v15 = vld [vmem:[#allocation5 + $0xd0] sm:$0xf0]  ;;  %323 = vmatpush.bf16.msra.mxu1 %v597_v7  ;;  %v577_v16 = vor.u32 %v636_v13, %v576_v11  ;;  %v584_v18 = vld [vmem:[#allocation5 + $0xc8] sm:$0xf]  ;;  %v637_v19 = vld [vmem:[#allocation5 + $0xd4] sm:$0xf0] }
  0x14   :  { %352 = vmatpush.bf16.msra.mxu2 %v601_v8  ;;  %v581_v17 = vor.u32 %v634_v14, %v578_v15  ;;  %v635_v20 = vld [vmem:[#allocation5 + $0xcc] sm:$0xf]  ;;  %381 = vmatpush.bf16.msra.mxu3 %v605_v12  ;;  %v585_v21 = vor.u32 %v637_v19, %v584_v18  ;;  %v586_v22 = vld [vmem:[#allocation5 + $0xd8] sm:$0xf0]  ;;  %v560_v23 = vld [vmem:[#allocation5 + $0xa0] sm:$0xf] }
  0x15   :  { %v632_v24 = vld [vmem:[#allocation5 + $0xac] sm:$0xf0]  ;;  %v589_v25 = vor.u32 %v635_v20, %v586_v22  ;;  %v630_v26 = vld [vmem:[#allocation5 + $0xa4] sm:$0xf]  ;;  %v562_v27 = vld [vmem:[#allocation5 + $0xb0] sm:$0xf0] }
  0x16   :  { %v568_v28 = vld [vmem:[#allocation5 + $0xa8] sm:$0xf]  ;;  %295 = vmatpush.bf16.msra.mxu0 %v577_v16  ;;  %v561_v29 = vor.u32 %v632_v24, %v560_v23  ;;  %v633_v30 = vld [vmem:[#allocation5 + $0xb4] sm:$0xf0]  ;;  %v631_v31 = vld [vmem:[#allocation5 + $0xac] sm:$0xf]  ;;  %v565_v33 = vor.u32 %v630_v26, %v562_v27 }
  0x17   :  { %v570_v32 = vld [vmem:[#allocation5 + $0xb8] sm:$0xf0]  ;;  %324 = vmatpush.bf16.msra.mxu1 %v581_v17  ;;  %v569_v34 = vor.u32 %v633_v30, %v568_v28  ;;  %v544_v35 = vld [vmem:[#allocation5 + $0x80] sm:$0xf]  ;;  %v628_v36 = vld [vmem:[#allocation5 + $0x8c] sm:$0xf0] }
  0x18   :  { %353 = vmatpush.bf16.msra.mxu2 %v585_v21  ;;  %v626_v37 = vld [vmem:[#allocation5 + $0x84] sm:$0xf]  ;;  %382 = vmatpush.bf16.msra.mxu3 %v589_v25  ;;  %v573_v38 = vor.u32 %v631_v31, %v570_v32  ;;  %v546_v39 = vld [vmem:[#allocation5 + $0x90] sm:$0xf0]  ;;  %v552_v40 = vld [vmem:[#allocation5 + $0x88] sm:$0xf]  ;;  %v545_v44 = vor.u32 %v628_v36, %v544_v35 }
  0x19   :  { %v629_v41 = vld [vmem:[#allocation5 + $0x94] sm:$0xf0]  ;;  %v627_v42 = vld [vmem:[#allocation5 + $0x8c] sm:$0xf]  ;;  %v554_v43 = vld [vmem:[#allocation5 + $0x98] sm:$0xf0]  ;;  %v549_v45 = vor.u32 %v626_v37, %v546_v39 }
  0x1a   :  { %296 = vmatpush.bf16.msra.mxu0 %v561_v29  ;;  %v553_v46 = vor.u32 %v629_v41, %v552_v40  ;;  %v528_v47 = vld [vmem:[#allocation5 + $0x60] sm:$0xf]  ;;  %v624_v48 = vld [vmem:[#allocation5 + $0x6c] sm:$0xf0]  ;;  %v622_v49 = vld [vmem:[#allocation5 + $0x64] sm:$0xf]  ;;  %v557_v50 = vor.u32 %v627_v42, %v554_v43 }
  0x1b   :  { %325 = vmatpush.bf16.msra.mxu1 %v565_v33  ;;  %v530_v51 = vld [vmem:[#allocation5 + $0x70] sm:$0xf0]  ;;  %v536_v52 = vld [vmem:[#allocation5 + $0x68] sm:$0xf]  ;;  %v625_v53 = vld [vmem:[#allocation5 + $0x74] sm:$0xf0]  ;;  %v529_v56 = vor.u32 %v624_v48, %v528_v47 }
  0x1c   :  { %354 = vmatpush.bf16.msra.mxu2 %v569_v34  ;;  %383 = vmatpush.bf16.msra.mxu3 %v573_v38  ;;  %v623_v54 = vld [vmem:[#allocation5 + $0x6c] sm:$0xf]  ;;  %v538_v55 = vld [vmem:[#allocation5 + $0x78] sm:$0xf0]  ;;  %v533_v57 = vor.u32 %v622_v49, %v530_v51  ;;  %v537_v58 = vor.u32 %v625_v53, %v536_v52  ;;  %v512_v59 = vld [vmem:[#allocation5 + $0x40] sm:$0xf] }
  0x1d   :  { %v620_v60 = vld [vmem:[#allocation5 + $0x4c] sm:$0xf0]  ;;  %v618_v61 = vld [vmem:[#allocation5 + $0x44] sm:$0xf]  ;;  %v541_v62 = vor.u32 %v623_v54, %v538_v55  ;;  %v514_v63 = vld [vmem:[#allocation5 + $0x50] sm:$0xf0] }
  0x1e   :  { %297 = vmatpush.bf16.msra.mxu0 %v545_v44  ;;  %v520_v0 = vld [vmem:[#allocation5 + $0x48] sm:$0xf]  ;;  %v621_v1 = vld [vmem:[#allocation5 + $0x54] sm:$0xf0]  ;;  %v619_v2 = vld [vmem:[#allocation5 + $0x4c] sm:$0xf]  ;;  %v513_v4 = vor.u32 %v620_v60, %v512_v59  ;;  %v517_v5 = vor.u32 %v618_v61, %v514_v63 }
  0x1f   :  { %326 = vmatpush.bf16.msra.mxu1 %v549_v45  ;;  %v522_v3 = vld [vmem:[#allocation5 + $0x58] sm:$0xf0]  ;;  %v521_v6 = vor.u32 %v621_v1, %v520_v0  ;;  %v496_v7 = vld [vmem:[#allocation5 + $0x20] sm:$0xf]  ;;  %v616_v8 = vld [vmem:[#allocation5 + $0x2c] sm:$0xf0] }
  0x20   :  { %355 = vmatpush.bf16.msra.mxu2 %v553_v46  ;;  %384 = vmatpush.bf16.msra.mxu3 %v557_v50  ;;  %v614_v9 = vld [vmem:[#allocation5 + $0x24] sm:$0xf]  ;;  %v525_v10 = vor.u32 %v619_v2, %v522_v3  ;;  %v498_v11 = vld [vmem:[#allocation5 + $0x30] sm:$0xf0]  ;;  %v504_v12 = vld [vmem:[#allocation5 + $0x28] sm:$0xf]  ;;  %v497_v16 = vor.u32 %v616_v8, %v496_v7 }
  0x21   :  { %v617_v13 = vld [vmem:[#allocation5 + $0x34] sm:$0xf0]  ;;  %v615_v14 = vld [vmem:[#allocation5 + $0x2c] sm:$0xf]  ;;  %v506_v15 = vld [vmem:[#allocation5 + $0x38] sm:$0xf0]  ;;  %v501_v17 = vor.u32 %v614_v9, %v498_v11 }
  0x22   :  { %298 = vmatpush.bf16.msra.mxu0 %v529_v56  ;;  %v505_v18 = vor.u32 %v617_v13, %v504_v12  ;;  %v480_v19 = vld [vmem:[#allocation5] sm:$0xf]  ;;  %v612_v20 = vld [vmem:[#allocation5 + $0xc] sm:$0xf0]  ;;  %v610_v21 = vld [vmem:[#allocation5 + $0x4] sm:$0xf]  ;;  %v509_v22 = vor.u32 %v615_v14, %v506_v15 }
  0x23   :  { %327 = vmatpush.bf16.msra.mxu1 %v533_v57  ;;  %v482_v23 = vld [vmem:[#allocation5 + $0x10] sm:$0xf0]  ;;  %v488_v24 = vld [vmem:[#allocation5 + $0x8] sm:$0xf]  ;;  %v613_v25 = vld [vmem:[#allocation5 + $0x14] sm:$0xf0]  ;;  %v481_v28 = vor.u32 %v612_v20, %v480_v19 }
  0x24   :  { %356 = vmatpush.bf16.msra.mxu2 %v537_v58  ;;  %385 = vmatpush.bf16.msra.mxu3 %v541_v62  ;;  %v611_v26 = vld [vmem:[#allocation5 + $0xc] sm:$0xf]  ;;  %v490_v27 = vld [vmem:[#allocation5 + $0x18] sm:$0xf0]  ;;  %v485_v29 = vor.u32 %v610_v21, %v482_v23  ;;  %v489_v30 = vor.u32 %v613_v25, %v488_v24  ;;  %v606_v32 = vld [vmem:[#allocation2] sm:$0xff]  ;;  %s759_s2 = smov [#allocation8]  }
  0x25   :  { %v493_v31 = vor.u32 %v611_v26, %v490_v27  ;;  %v607_v33 = vld [vmem:[#allocation2 + $0x8] sm:$0xff]  ;;  %v608_v34 = vld [vmem:[#allocation2 + $0x10] sm:$0xff]  ;;  %v609_v35 = vld [vmem:[#allocation2 + $0x18] sm:$0xff]  ;;  %s446_s29 = sshll.u32 %s759_s2, 4  ;;  %s448_s5 = sshll.u32 %s841_s3, 4  ;;  %s447_s29 = int_to_ptr.vmem [resolvable:$true] %s446_s29  ;;  %s449_s5 = int_to_ptr.hbm [resolvable:$true] %s448_s5 }
  0x26   :  { %299 = vmatpush.bf16.msra.mxu0 %v513_v4  ;;  %v100_v36 = vld [vmem:[#allocation7] sm:$0xf] }
  0x27   :  { %328 = vmatpush.bf16.msra.mxu1 %v517_v5  ;;  %v792_v37 = vperm.slane %v100_v36, 0  ;;  %v794_v38 = vperm.slane %v100_v36, 1  ;;  %v798_v44 = vperm.slane %v100_v36, 2  ;;  %v800_v45 = vperm.slane %v100_v36, 3 }
  0x28   :  { %357 = vmatpush.bf16.msra.mxu2 %v521_v6  ;;  %386 = vmatpush.bf16.msra.mxu3 %v525_v10 }
  0x2a   :  { %300 = vmatpush.bf16.msra.mxu0 %v497_v16 }
  0x2b   :  { %329 = vmatpush.bf16.msra.mxu1 %v501_v17 }
  0x2c   :  { %358 = vmatpush.bf16.msra.mxu2 %v505_v18  ;;  %387 = vmatpush.bf16.msra.mxu3 %v509_v22 }
  0x2e   :  { %301 = vmatpush.bf16.msra.mxu0 %v481_v28 }
  0x2f   :  { %330 = vmatpush.bf16.msra.mxu1 %v485_v29 }
  0x30   :  { %359 = vmatpush.bf16.msra.mxu2 %v489_v30  ;;  %388 = vmatpush.bf16.msra.mxu3 %v493_v31 }
  0x31   :  { %302 = vmatmul.bf16.vlgmr.msra.gmra.mxu0 %v606_v32 }
  0x32   :  { %331 = vmatmul.bf16.vlgmr.msra.gmra.mxu1 %v606_v32 }
  0x33   :  { %360 = vmatmul.bf16.vlgmr.msra.gmra.mxu2 %v606_v32  ;;  %389 = vmatmul.bf16.vlgmr.msra.gmra.mxu3 %v606_v32 }
  0x41   :  { %307 = vmatmul.bf16.gmra.mxu0 %v607_v33 }
  0x42   :  { %336 = vmatmul.bf16.gmra.mxu1 %v607_v33 }
  0x43   :  { %365 = vmatmul.bf16.gmra.mxu2 %v607_v33  ;;  %394 = vmatmul.bf16.gmra.mxu3 %v607_v33 }
  0x51   :  { %312 = vmatmul.bf16.gmra.mxu0 %v608_v34 }
  0x52   :  { %341 = vmatmul.bf16.gmra.mxu1 %v608_v34 }
  0x53   :  { %370 = vmatmul.bf16.gmra.mxu2 %v608_v34  ;;  %399 = vmatmul.bf16.gmra.mxu3 %v608_v34 }
  0x61   :  { %317 = vmatmul.bf16.gmra.mxu0 %v609_v35 }
  0x62   :  { %346 = vmatmul.bf16.gmra.mxu1 %v609_v35 }
  0x63   :  { %375 = vmatmul.bf16.gmra.mxu2 %v609_v35  ;;  %404 = vmatmul.bf16.gmra.mxu3 %v609_v35 }
  0xae   :  { %v303_v39 = vpop.f32.mrf.mxu0 }
  0xaf   :  { %v304_v40 = vadd.f32 %v303_v39, %v792_v37  ;;  %v332_v41 = vpop.f32.mrf.mxu1 }
  0xb0   :  { %v333_v42 = vadd.f32 %v332_v41, %v794_v38 }
  0xb2   :  { %v410_v43 = vpack.c.bf16 %v333_v42, %v304_v40 }
  0xb4   :  { %426 = vst [vmem:[#allocation8] sm:$0xff] %v410_v43 }
  0xb6   :  { %v361_v46 = vpop.f32.mrf.mxu2  ;;  %v390_v48 = vpop.f32.mrf.mxu3 }
  0xb7   :  { %v362_v47 = vadd.f32 %v361_v46, %v798_v44  ;;  %v305_v49 = vpop.f32.mrf.mxu0  ;;  %v391_v50 = vadd.f32 %v390_v48, %v800_v45  ;;  %v334_v52 = vpop.f32.mrf.mxu1 }
  0xb8   :  { %v306_v51 = vadd.f32 %v305_v49, %v792_v37  ;;  %v335_v53 = vadd.f32 %v334_v52, %v794_v38 }
  0xb9   :  { %v411_v54 = vpack.c.bf16 %v391_v50, %v362_v47 }
  0xba   :  { %v412_v55 = vpack.c.bf16 %v335_v53, %v306_v51 }
  0xbb   :  { %427 = vst [vmem:[#allocation8 + $0x8] sm:$0xff] %v411_v54 }
  0xbc   :  { %428 = vst [vmem:[#allocation8 + $0x10] sm:$0xff] %v412_v55 }
  0xbe   :  { %v363_v56 = vpop.f32.mrf.mxu2  ;;  %v392_v58 = vpop.f32.mrf.mxu3 }
  0xbf   :  { %v364_v57 = vadd.f32 %v363_v56, %v798_v44  ;;  %v308_v59 = vpop.f32.mrf.mxu0  ;;  %v393_v60 = vadd.f32 %v392_v58, %v800_v45  ;;  %v337_v62 = vpop.f32.mrf.mxu1 }
  0xc0   :  { %v309_v61 = vadd.f32 %v308_v59, %v792_v37  ;;  %v338_v63 = vadd.f32 %v337_v62, %v794_v38 }
  0xc1   :  { %v413_v0 = vpack.c.bf16 %v393_v60, %v364_v57 }
  0xc2   :  { %v414_v1 = vpack.c.bf16 %v338_v63, %v309_v61 }
  0xc3   :  { %429 = vst [vmem:[#allocation8 + $0x18] sm:$0xff] %v413_v0 }
  0xc4   :  { %430 = vst [vmem:[#allocation8 + $0x20] sm:$0xff] %v414_v1 }
  0xc6   :  { %v366_v2 = vpop.f32.mrf.mxu2  ;;  %v395_v4 = vpop.f32.mrf.mxu3 }
  0xc7   :  { %v367_v3 = vadd.f32 %v366_v2, %v798_v44  ;;  %v310_v5 = vpop.f32.mrf.mxu0  ;;  %v396_v6 = vadd.f32 %v395_v4, %v800_v45  ;;  %v339_v8 = vpop.f32.mrf.mxu1 }
  0xc8   :  { %v311_v7 = vadd.f32 %v310_v5, %v792_v37  ;;  %v340_v9 = vadd.f32 %v339_v8, %v794_v38 }
  0xc9   :  { %v415_v10 = vpack.c.bf16 %v396_v6, %v367_v3 }
  0xca   :  { %v416_v11 = vpack.c.bf16 %v340_v9, %v311_v7 }
  0xcb   :  { %431 = vst [vmem:[#allocation8 + $0x28] sm:$0xff] %v415_v10 }
  0xcc   :  { %432 = vst [vmem:[#allocation8 + $0x30] sm:$0xff] %v416_v11 }
  0xce   :  { %v368_v12 = vpop.f32.mrf.mxu2  ;;  %v397_v14 = vpop.f32.mrf.mxu3 }
  0xcf   :  { %v369_v13 = vadd.f32 %v368_v12, %v798_v44  ;;  %v313_v15 = vpop.f32.mrf.mxu0  ;;  %v398_v16 = vadd.f32 %v397_v14, %v800_v45  ;;  %v342_v18 = vpop.f32.mrf.mxu1 }
  0xd0   :  { %v314_v17 = vadd.f32 %v313_v15, %v792_v37  ;;  %v343_v19 = vadd.f32 %v342_v18, %v794_v38 }
  0xd1   :  { %v417_v20 = vpack.c.bf16 %v398_v16, %v369_v13 }
  0xd2   :  { %v418_v21 = vpack.c.bf16 %v343_v19, %v314_v17 }
  0xd3   :  { %433 = vst [vmem:[#allocation8 + $0x38] sm:$0xff] %v417_v20 }
  0xd4   :  { %434 = vst [vmem:[#allocation8 + $0x40] sm:$0xff] %v418_v21 }
  0xd6   :  { %v371_v22 = vpop.f32.mrf.mxu2  ;;  %v400_v24 = vpop.f32.mrf.mxu3 }
  0xd7   :  { %v372_v23 = vadd.f32 %v371_v22, %v798_v44  ;;  %v315_v25 = vpop.f32.mrf.mxu0  ;;  %v401_v26 = vadd.f32 %v400_v24, %v800_v45  ;;  %v344_v28 = vpop.f32.mrf.mxu1 }
  0xd8   :  { %v316_v27 = vadd.f32 %v315_v25, %v792_v37  ;;  %v345_v29 = vadd.f32 %v344_v28, %v794_v38 }
  0xd9   :  { %v419_v30 = vpack.c.bf16 %v401_v26, %v372_v23 }
  0xda   :  { %v420_v31 = vpack.c.bf16 %v345_v29, %v316_v27 }
  0xdb   :  { %435 = vst [vmem:[#allocation8 + $0x48] sm:$0xff] %v419_v30 }
  0xdc   :  { %436 = vst [vmem:[#allocation8 + $0x50] sm:$0xff] %v420_v31 }
  0xde   :  { %v373_v32 = vpop.f32.mrf.mxu2  ;;  %v402_v34 = vpop.f32.mrf.mxu3 }
  0xdf   :  { %v374_v33 = vadd.f32 %v373_v32, %v798_v44  ;;  %v318_v35 = vpop.f32.mrf.mxu0  ;;  %v403_v36 = vadd.f32 %v402_v34, %v800_v45  ;;  %v347_v40 = vpop.f32.mrf.mxu1 }
  0xe0   :  { %v319_v39 = vadd.f32 %v318_v35, %v792_v37  ;;  %v348_v41 = vadd.f32 %v347_v40, %v794_v38 }
  0xe1   :  { %v421_v42 = vpack.c.bf16 %v403_v36, %v374_v33 }
  0xe2   :  { %v422_v43 = vpack.c.bf16 %v348_v41, %v319_v39 }
  0xe3   :  { %437 = vst [vmem:[#allocation8 + $0x58] sm:$0xff] %v421_v42 }
  0xe4   :  { %438 = vst [vmem:[#allocation8 + $0x60] sm:$0xff] %v422_v43 }
  0xe6   :  { %v376_v46 = vpop.f32.mrf.mxu2  ;;  %v405_v48 = vpop.f32.mrf.mxu3 }
  0xe7   :  { %v377_v47 = vadd.f32 %v376_v46, %v798_v44  ;;  %v320_v49 = vpop.f32.mrf.mxu0  ;;  %v406_v50 = vadd.f32 %v405_v48, %v800_v45  ;;  %v349_v52 = vpop.f32.mrf.mxu1 }
  0xe8   :  { %v321_v51 = vadd.f32 %v320_v49, %v792_v37  ;;  %v350_v53 = vadd.f32 %v349_v52, %v794_v38 }
  0xe9   :  { %v423_v54 = vpack.c.bf16 %v406_v50, %v377_v47 }
  0xea   :  { %v424_v55 = vpack.c.bf16 %v350_v53, %v321_v51 }
  0xeb   :  { %439 = vst [vmem:[#allocation8 + $0x68] sm:$0xff] %v423_v54 }
  0xec   :  { %440 = vst [vmem:[#allocation8 + $0x70] sm:$0xff] %v424_v55 }
  0xee   :  { %v378_v56 = vpop.f32.mrf.mxu2  ;;  %v407_v58 = vpop.f32.mrf.mxu3 }
  0xef   :  { %v379_v57 = vadd.f32 %v378_v56, %v798_v44  ;;  %v408_v59 = vadd.f32 %v407_v58, %v800_v45 }
  0xf1   :  { %v425_v37 = vpack.c.bf16 %v408_v59, %v379_v57 }
  0xf3   :  { %441 = vst [vmem:[#allocation8 + $0x78] sm:$0xff] %v425_v37 }
  0xf4   :  { %454 = dma.vmem_to_hbm [thread:$0]  %s447_s29, 2048, %s449_s5, [#allocation4], %s753_s20, %s753_s20, %s754_s21  }
  0xf5   :  { %750 = dma.done.wait [#allocation4], 2048  }
  0xf6   :  { %751 = vsyncadd [#allocation4], 4294965248 }
  0xf7   :  { %459 = vsyncpa [#allocation3], 1 }
  0xf8   :  { %460 = vsyncpa [#allocation6], 1 }
  0xf9   :  { %461 = vsyncpa [#allocation4], 1 }

</bundles_post_ra>
